<compile_context>
chip_gen: v7x
topology: tpu7x:2x2x1
jax: 0.10.0
libtpu: 0.0.40
codegen_flags: <defaults>
</compile_context>

<pallas_src>
import jax
import jax.numpy as jnp
import numpy as np
from jax.experimental import pallas as pl
from jax.experimental.pallas import tpu as pltpu


def _row_vmem_bytes(L, D, out_itemsize):
    """Per-batch-row VMEM footprint of one pipeline step (honest accounting)."""
    pad_c = ((D + 1 + 7) // 8) * 8           # channel dim of out block pads to 8 sublanes
    return (2 * L * 4                        # double-buffered x block (counted at f32 width)
            + 2 * pad_c * L * out_itemsize   # double-buffered, sublane-padded out block
            + 4 * L * 4)                     # live f32 temps: acc + shifted copy + upcast + slack


def _choose_block_n(N, L, D, itemsize):
    """Pick batch-tile height TN.

    Priorities (perf review):
      1. per-step working set stays under VMEM_BUDGET (safe on v7x 64 MiB physical),
      2. enough grid steps for DMA overlap and v7x dual-TC batch sharding,
      3. each step still moves a few MiB of HBM traffic (amortize ~0.35us/step).
    """
    row_vmem = _row_vmem_bytes(L, D, itemsize)
    row_hbm = (1 + (D + 1)) * L * itemsize   # read x + write D+1 channels, per row

    VMEM_BUDGET = 16 << 20
    MIN_STEPS = 8                            # >= ~4 steps per TensorCore on v7x dual-TC
    TARGET_STEP_HBM = 4 << 20

    tn = -(-TARGET_STEP_HBM // row_hbm)      # aim for ~4 MiB of HBM traffic per step
    steps_cap = N // MIN_STEPS
    if steps_cap >= 8:                       # enforce a long grid only when tiles stay >= 8 rows
        tn = min(tn, steps_cap)
    tn = min(tn, max(1, VMEM_BUDGET // row_vmem), N)
    tn = max(tn, 1)
    if tn < N:
        tn = max(8, (tn // 8) * 8)           # sublane-aligned tiles when actually tiling
    return tn


def _vmem_limit_bytes(tn, L, D, itemsize):
    footprint = tn * _row_vmem_bytes(L, D, itemsize) + (1 << 20)
    limit = footprint + footprint // 2       # 1.5x headroom over the estimate
    return int(min(48 << 20, max(16 << 20, limit)))


def make_parallel_conv1d_dilations(dilation_list=(1, 2, 4), kernel_size=3, block_n=None):
    dilation_list = tuple(dilation_list)
    D = len(dilation_list)
    K = kernel_size

    def kernel(w_ref, x_ref, o_ref):
        # w_ref: SMEM (D, K) f32 scalars
        # x_ref: VMEM (TN, L) input tile (native dtype)
        # o_ref: VMEM (TN, D+1, L) output tile (PyTorch channel layout, written directly)
        xs = x_ref[...]                      # bf16 stays bf16 through the rolls (v6e/v7x)
        L = xs.shape[-1]
        lane_dense = (L % 128 == 0)

        def shifted(off):
            # shifted[n, t] == x[n, (t + off) mod L]
            if off % L == 0:
                return xs
            if lane_dense:
                return pltpu.roll(xs, shift=(-off) % L, axis=xs.ndim - 1)   # XLU rotate
            s = off % L
            return jnp.concatenate([xs[:, s:], xs[:, :s]], axis=-1)

        # Channel-major: one live f32 accumulator; each channel is stored as soon as
        # its last tap lands (keeps VMEM temp pressure at ~2-3 (TN, L) buffers).
        for di, dil in enumerate(dilation_list):
            acc = None
            for j in range(K):
                off = (j - K // 2) * dil
                contrib = w_ref[di, j] * shifted(off).astype(jnp.float32)
                acc = contrib if acc is None else acc + contrib
            o_ref[:, di, :] = acc.astype(o_ref.dtype)
        # skip connection: the input itself is the last channel
        o_ref[:, D, :] = xs.astype(o_ref.dtype)

    def forward(x, weights):
        # x: (N, 1, L), weights: (D, K)  (one Conv1d(1, 1, K) weight per dilation)
        N, C, L = x.shape
        assert C == 1, "ParallelConv1DDilations uses Conv1d(1, 1, ...)"
        assert weights.shape == (D, K)
        x2 = x[:, 0, :]                      # (N, L): batch -> sublanes, length -> lanes
        w = weights.astype(jnp.float32)

        itemsize = jnp.dtype(x.dtype).itemsize
        TN = block_n if block_n is not None else _choose_block_n(N, L, D, itemsize)
        TN = min(TN, N)
        grid = (pl.cdiv(N, TN),)

        out = pl.pallas_call(
            kernel,
            out_shape=jax.ShapeDtypeStruct((N, D + 1, L), x.dtype),
            grid=grid,
            in_specs=[
                pl.BlockSpec(memory_space=pltpu.MemorySpace.SMEM),        # weights (whole)
                pl.BlockSpec((TN, L), lambda i: (i, 0)),                  # x batch tile
            ],
            out_specs=pl.BlockSpec((TN, D + 1, L), lambda i: (i, 0, 0)),  # direct NCL write
            compiler_params=pltpu.CompilerParams(
                dimension_semantics=("parallel",),                        # v7x dual-TC sharding
                vmem_limit_bytes=_vmem_limit_bytes(TN, L, D, itemsize),   # explicit, per review
            ),
        )(w, x2)
        return out

    return forward


def reference_forward(x, weights, dilation_list, kernel_size):
    """Pure-JAX reference of the PyTorch forward (circular dilated conv)."""
    xs = x[:, 0, :]
    K = kernel_size
    outs = []
    for di, d in enumerate(dilation_list):
        acc = jnp.zeros_like(xs)
        for j in range(K):
            off = (j - K // 2) * d
            acc = acc + weights[di, j] * jnp.roll(xs, -off, axis=1)   # x[(t+off) mod L]
        outs.append(acc)
    outs.append(xs)
    return jnp.stack(outs, axis=1)


if __name__ == "__main__":
    dilation_list = (1, 2, 4)
    kernel_size = 3
    D = len(dilation_list)

    key = jax.random.PRNGKey(0)
    kx1, kw, kx2, kx3 = jax.random.split(key, 4)
    weights = 0.5 * jax.random.normal(kw, (D, kernel_size), dtype=jnp.float32)

    # Test 1: tiny shape (module-scale), ragged L -> slice+concat path, single-step grid.
    N1, L1 = 2, 16
    x1 = jax.random.normal(kx1, (N1, 1, L1), dtype=jnp.float32)
    fwd1 = make_parallel_conv1d_dilations(dilation_list, kernel_size)
    out1 = jax.block_until_ready(fwd1(x1, weights))
    ref1 = reference_forward(x1, weights, dilation_list, kernel_size)
    assert out1.shape == (N1, D + 1, L1)
    np.testing.assert_allclose(np.asarray(out1), np.asarray(ref1), rtol=1e-5, atol=1e-5)

    # Test 2: lane-dense L, multi-step batch grid -> pltpu.roll path, pipelined tiles.
    N2, L2 = 16, 256
    x2 = jax.random.normal(kx2, (N2, 1, L2), dtype=jnp.float32)
    fwd2 = make_parallel_conv1d_dilations(dilation_list, kernel_size, block_n=8)
    out2 = jax.block_until_ready(fwd2(x2, weights))
    ref2 = reference_forward(x2, weights, dilation_list, kernel_size)
    assert out2.shape == (N2, D + 1, L2)
    np.testing.assert_allclose(np.asarray(out2), np.asarray(ref2), rtol=1e-5, atol=1e-5)

    # Test 3: N not a multiple of TN -> partial last tile (locks in OOB-row masking;
    # rows are independent since shifts are only along L).
    N3, L3 = 12, 256
    x3 = jax.random.normal(kx3, (N3, 1, L3), dtype=jnp.float32)
    fwd3 = make_parallel_conv1d_dilations(dilation_list, kernel_size, block_n=8)
    out3 = jax.block_until_ready(fwd3(x3, weights))
    ref3 = reference_forward(x3, weights, dilation_list, kernel_size)
    assert out3.shape == (N3, D + 1, L3)
    np.testing.assert_allclose(np.asarray(out3), np.asarray(ref3), rtol=1e-5, atol=1e-5)

    print("KERNEL_OK")
</pallas_src>

<mosaic_0001>
module attributes {stable_mosaic.version = 11 : i64} {
  func.func @kernel(%arg0: i32, %arg1: memref<3x3xf32, #tpu.memory_space<smem>>, %arg2: memref<2x16xf32, #tpu.memory_space<vmem>>, %arg3: memref<2x4x16xf32, #tpu.memory_space<vmem>>) attributes {dimension_semantics = [#tpu.dimension_semantics<parallel>], iteration_bounds = array<i64: 1>, scalar_prefetch = 0 : i64, scratch_operands = 0 : i64, tpu.core_type = #tpu.core_type<tc>, window_params = [{transform_indices = @transform_0, window_bounds = array<i64: 3, 3>}, {transform_indices = @transform_1, window_bounds = array<i64: 2, 16>}, {transform_indices = @transform_2, window_bounds = array<i64: 2, 4, 16>}]} {
    %c0 = arith.constant 0 : index
    %c0_0 = arith.constant 0 : index
    %0 = vector.load %arg2[%c0, %c0_0] : memref<2x16xf32, #tpu.memory_space<vmem>>, vector<2x16xf32>
    %c0_1 = arith.constant 0 : index
    %c0_2 = arith.constant 0 : index
    %1 = memref.load %arg1[%c0_1, %c0_2] : memref<3x3xf32, #tpu.memory_space<smem>>
    %2 = vector.extract_strided_slice %0 {offsets = [0, 15], sizes = [2, 1], strides = [1, 1]} : vector<2x16xf32> to vector<2x1xf32>
    %3 = vector.extract_strided_slice %0 {offsets = [0, 0], sizes = [2, 15], strides = [1, 1]} : vector<2x16xf32> to vector<2x15xf32>
    %4 = tpu.concatenate %2, %3 in 1 : vector<2x1xf32>, vector<2x15xf32> -> vector<2x16xf32>
    %5 = vector.broadcast %1 : f32 to vector<2x16xf32>
    %6 = arith.mulf %5, %4 : vector<2x16xf32>
    %c0_3 = arith.constant 0 : index
    %c1 = arith.constant 1 : index
    %7 = memref.load %arg1[%c0_3, %c1] : memref<3x3xf32, #tpu.memory_space<smem>>
    %8 = vector.broadcast %7 : f32 to vector<2x16xf32>
    %9 = arith.mulf %8, %0 : vector<2x16xf32>
    %10 = arith.addf %6, %9 : vector<2x16xf32>
    %c0_4 = arith.constant 0 : index
    %c2 = arith.constant 2 : index
    %11 = memref.load %arg1[%c0_4, %c2] : memref<3x3xf32, #tpu.memory_space<smem>>
    %12 = vector.extract_strided_slice %0 {offsets = [0, 1], sizes = [2, 15], strides = [1, 1]} : vector<2x16xf32> to vector<2x15xf32>
    %13 = vector.extract_strided_slice %0 {offsets = [0, 0], sizes = [2, 1], strides = [1, 1]} : vector<2x16xf32> to vector<2x1xf32>
    %14 = tpu.concatenate %12, %13 in 1 : vector<2x15xf32>, vector<2x1xf32> -> vector<2x16xf32>
    %15 = vector.broadcast %11 : f32 to vector<2x16xf32>
    %16 = arith.mulf %15, %14 : vector<2x16xf32>
    %17 = arith.addf %10, %16 : vector<2x16xf32>
    %c0_5 = arith.constant 0 : index
    %c0_6 = arith.constant 0 : index
    %c0_7 = arith.constant 0 : index
    %18 = vector.load %arg3[%c0_5, %c0_6, %c0_7] : memref<2x4x16xf32, #tpu.memory_space<vmem>>, vector<2x1x16xf32>
    %19 = vector.shape_cast %18 : vector<2x1x16xf32> to vector<2x16xf32>
    %20 = vector.shape_cast %17 : vector<2x16xf32> to vector<2x1x16xf32>
    tpu.vector_store %arg3[%c0_5, %c0_6, %c0_7], %20 {strides = array<i32>} : memref<2x4x16xf32, #tpu.memory_space<vmem>>, vector<2x1x16xf32>,
    %c1_8 = arith.constant 1 : index
    %c0_9 = arith.constant 0 : index
    %21 = memref.load %arg1[%c1_8, %c0_9] : memref<3x3xf32, #tpu.memory_space<smem>>
    %22 = vector.extract_strided_slice %0 {offsets = [0, 14], sizes = [2, 2], strides = [1, 1]} : vector<2x16xf32> to vector<2x2xf32>
    %23 = vector.extract_strided_slice %0 {offsets = [0, 0], sizes = [2, 14], strides = [1, 1]} : vector<2x16xf32> to vector<2x14xf32>
    %24 = tpu.concatenate %22, %23 in 1 : vector<2x2xf32>, vector<2x14xf32> -> vector<2x16xf32>
    %25 = vector.broadcast %21 : f32 to vector<2x16xf32>
    %26 = arith.mulf %25, %24 : vector<2x16xf32>
    %c1_10 = arith.constant 1 : index
    %c1_11 = arith.constant 1 : index
    %27 = memref.load %arg1[%c1_10, %c1_11] : memref<3x3xf32, #tpu.memory_space<smem>>
    %28 = vector.broadcast %27 : f32 to vector<2x16xf32>
    %29 = arith.mulf %28, %0 : vector<2x16xf32>
    %30 = arith.addf %26, %29 : vector<2x16xf32>
    %c1_12 = arith.constant 1 : index
    %c2_13 = arith.constant 2 : index
    %31 = memref.load %arg1[%c1_12, %c2_13] : memref<3x3xf32, #tpu.memory_space<smem>>
    %32 = vector.extract_strided_slice %0 {offsets = [0, 2], sizes = [2, 14], strides = [1, 1]} : vector<2x16xf32> to vector<2x14xf32>
    %33 = vector.extract_strided_slice %0 {offsets = [0, 0], sizes = [2, 2], strides = [1, 1]} : vector<2x16xf32> to vector<2x2xf32>
    %34 = tpu.concatenate %32, %33 in 1 : vector<2x14xf32>, vector<2x2xf32> -> vector<2x16xf32>
    %35 = vector.broadcast %31 : f32 to vector<2x16xf32>
    %36 = arith.mulf %35, %34 : vector<2x16xf32>
    %37 = arith.addf %30, %36 : vector<2x16xf32>
    %c0_14 = arith.constant 0 : index
    %c1_15 = arith.constant 1 : index
    %c0_16 = arith.constant 0 : index
    %38 = vector.load %arg3[%c0_14, %c1_15, %c0_16] : memref<2x4x16xf32, #tpu.memory_space<vmem>>, vector<2x1x16xf32>
    %39 = vector.shape_cast %38 : vector<2x1x16xf32> to vector<2x16xf32>
    %40 = vector.shape_cast %37 : vector<2x16xf32> to vector<2x1x16xf32>
    tpu.vector_store %arg3[%c0_14, %c1_15, %c0_16], %40 {strides = array<i32>} : memref<2x4x16xf32, #tpu.memory_space<vmem>>, vector<2x1x16xf32>,
    %c2_17 = arith.constant 2 : index
    %c0_18 = arith.constant 0 : index
    %41 = memref.load %arg1[%c2_17, %c0_18] : memref<3x3xf32, #tpu.memory_space<smem>>
    %42 = vector.extract_strided_slice %0 {offsets = [0, 12], sizes = [2, 4], strides = [1, 1]} : vector<2x16xf32> to vector<2x4xf32>
    %43 = vector.extract_strided_slice %0 {offsets = [0, 0], sizes = [2, 12], strides = [1, 1]} : vector<2x16xf32> to vector<2x12xf32>
    %44 = tpu.concatenate %42, %43 in 1 : vector<2x4xf32>, vector<2x12xf32> -> vector<2x16xf32>
    %45 = vector.broadcast %41 : f32 to vector<2x16xf32>
    %46 = arith.mulf %45, %44 : vector<2x16xf32>
    %c2_19 = arith.constant 2 : index
    %c1_20 = arith.constant 1 : index
    %47 = memref.load %arg1[%c2_19, %c1_20] : memref<3x3xf32, #tpu.memory_space<smem>>
    %48 = vector.broadcast %47 : f32 to vector<2x16xf32>
    %49 = arith.mulf %48, %0 : vector<2x16xf32>
    %50 = arith.addf %46, %49 : vector<2x16xf32>
    %c2_21 = arith.constant 2 : index
    %c2_22 = arith.constant 2 : index
    %51 = memref.load %arg1[%c2_21, %c2_22] : memref<3x3xf32, #tpu.memory_space<smem>>
    %52 = vector.extract_strided_slice %0 {offsets = [0, 4], sizes = [2, 12], strides = [1, 1]} : vector<2x16xf32> to vector<2x12xf32>
    %53 = vector.extract_strided_slice %0 {offsets = [0, 0], sizes = [2, 4], strides = [1, 1]} : vector<2x16xf32> to vector<2x4xf32>
    %54 = tpu.concatenate %52, %53 in 1 : vector<2x12xf32>, vector<2x4xf32> -> vector<2x16xf32>
    %55 = vector.broadcast %51 : f32 to vector<2x16xf32>
    %56 = arith.mulf %55, %54 : vector<2x16xf32>
    %57 = arith.addf %50, %56 : vector<2x16xf32>
    %c0_23 = arith.constant 0 : index
    %c2_24 = arith.constant 2 : index
    %c0_25 = arith.constant 0 : index
    %58 = vector.load %arg3[%c0_23, %c2_24, %c0_25] : memref<2x4x16xf32, #tpu.memory_space<vmem>>, vector<2x1x16xf32>
    %59 = vector.shape_cast %58 : vector<2x1x16xf32> to vector<2x16xf32>
    %60 = vector.shape_cast %57 : vector<2x16xf32> to vector<2x1x16xf32>
    tpu.vector_store %arg3[%c0_23, %c2_24, %c0_25], %60 {strides = array<i32>} : memref<2x4x16xf32, #tpu.memory_space<vmem>>, vector<2x1x16xf32>,
    %c0_26 = arith.constant 0 : index
    %c3 = arith.constant 3 : index
    %c0_27 = arith.constant 0 : index
    %61 = vector.load %arg3[%c0_26, %c3, %c0_27] : memref<2x4x16xf32, #tpu.memory_space<vmem>>, vector<2x1x16xf32>
    %62 = vector.shape_cast %61 : vector<2x1x16xf32> to vector<2x16xf32>
    %63 = vector.shape_cast %0 : vector<2x16xf32> to vector<2x1x16xf32>
    tpu.vector_store %arg3[%c0_26, %c3, %c0_27], %63 {strides = array<i32>} : memref<2x4x16xf32, #tpu.memory_space<vmem>>, vector<2x1x16xf32>,
    return
  }
  func.func @transform_0(%arg0: i32) -> (i32, i32) {
    %c0_i32 = arith.constant 0 : i32
    %c0_i32_0 = arith.constant 0 : i32
    %c0_i32_1 = arith.constant 0 : i32
    return %c0_i32, %c0_i32_0 : i32, i32
  }
  func.func @transform_1(%arg0: i32) -> (i32, i32) {
    %c0_i32 = arith.constant 0 : i32
    %c0_i32_0 = arith.constant 0 : i32
    return %arg0, %c0_i32 : i32, i32
  }
  func.func @transform_2(%arg0: i32) -> (i32, i32, i32) {
    %c0_i32 = arith.constant 0 : i32
    %c0_i32_0 = arith.constant 0 : i32
    %c0_i32_1 = arith.constant 0 : i32
    return %arg0, %c0_i32, %c0_i32_0 : i32, i32, i32
  }
}

</mosaic_0001>

<bundles_post_ra>
// kernel: tpu_custom_call.1
= control target key start
LH: loop header
LB: loop body
LE: loop exit
PB: predicated region body
PF: predicated region fallthrough
CT: control target
= control target key end

     0   :  { %7 = vsyncpa [#allocation4], 0  ;;  %s406_s0 = inlined_call_operand.hbm [shape: f32[3,3], index: 0, kind: input, shape index: {}]   ;;  %s407_s1 = inlined_call_operand.vmem [shape: f32[2,16], index: 1, kind: input, shape index: {}]   ;;  %s408_s2 = inlined_call_operand.hbm [shape: f32[2,4,16], index: 2, kind: output, shape index: {}]  }
   0x1   :  { %8 = vsyncpa [#allocation3], 0  ;;  %s255_s11 = scalar_lea.hbm %s406_s0, 64 }
   0x2   :  { %p256_p0 = scmp.ne.s32.totalorder %s406_s0, %s255_s11  ;;  %p259_p1 = scmp.lt.u32.totalorder %s255_s11, %s406_s0 }
   0x4   :  { %p261_p2 = pnand %p259_p1, %p256_p0 }
   0x6   :  { %264 = shalt.err (!%p261_p2)
}
   0x7   :  { %s291_s16 = smov [#allocation2]  }
   0x8   :  { %16 = dma.hbm_to_smem %s406_s0, 64, %s291_s16, [#allocation4]  }
   0x9   :  { %287 = dma.done.wait [#allocation4], 64  }
   0xa   :  { %288 = vsyncadd [#allocation4], 4294967232 }
   0xb   :  { %22 = sfence }
   0xc   :  { %v337_v0 = vld [vmem:[%s407_s1] sm:$0x3]  ;;  %s292_s21 = smov 114   ;;  %s293_s22 = smov 113   ;;  %v294_v1 = vmov 1966171168   ;;  %v56_v3 = vlaneseq }
   0xd   :  { %81 = vrot.lane.b32.xlu1 %v337_v0, %s292_s21  ;;  %26 = vrot.lane.b32.xlu0 %v337_v0, %s293_s22  ;;  %v54_v2 = vunpack.c.l.s4 %v294_v1  ;;  %s295_s23 = smov 2   ;;  %s296_s0 = smov 1   ;;  %vm77_vm0 = vcmask 122880   ;;  %vm32_vm1 = vcmask 7168   ;;  %vm87_vm2 = vcmask 15360  }
   0xe   :  { %v57_v5 = vshrl.u32 %v56_v3, 7  ;;  %s297_s24 = smov 4   ;;  %s298_s1 = smov 116   ;;  %vm47_vm3 = vcmask 121856   ;;  %vm141_vm4 = vcmask 31744   ;;  %vm102_vm5 = vcmask 113664  }
   0xf   :  { %v55_v4 = vunpack.c.0.s8 %v54_v2  ;;  %s299_s25 = smov 15   ;;  %s300_s26 = smov 127   ;;  %vm156_vm6 = vcmask 97280  }
  0x10   :  { %s301_s27 = smov 14   ;;  %s302_s28 = smov 126  }
  0x11   :  { %84 = vrot.lane.b32.xlu1 %v337_v0, %s295_s23  ;;  %29 = vrot.lane.b32.xlu0 %v337_v0, %s296_s0  ;;  %v346_v6 = vsub.s32 %v55_v4, %v57_v5  ;;  %s303_s29 = smov 12   ;;  %s304_s30 = smov 124  }
  0x12   :  { %s24_s3 = sld [smem:[#allocation2]]  ;;  %s231_s4 = sld [smem:[#allocation2 + $0x1]] }
  0x13   :  { %v194_v7 = vrot.slane %v337_v0, %v346_v6  ;;  %s234_s5 = sld [smem:[#allocation2 + $0x81]]  ;;  %s233_s6 = sld [smem:[#allocation2 + $0x80]] }
  0x14   :  { %s360_s7 = sld [smem:[#allocation2 + $0x2]]  ;;  %s362_s8 = sld [smem:[#allocation2 + $0x101]] }
  0x15   :  { %138 = vrot.lane.b32.xlu1 %v337_v0, %s297_s24  ;;  %135 = vrot.lane.b32.xlu0 %v337_v0, %s298_s1  ;;  %v195_v8 = vcombine.high %v194_v7, %v194_v7  ;;  %v202_v9 = vrot.slane %v194_v7, %v346_v6  ;;  %s364_s9 = sld [smem:[#allocation2 + $0x100]]  ;;  %s366_s10 = sld [smem:[#allocation2 + $0x82]] }
  0x16   :  { %s370_s11 = sld [smem:[#allocation2 + $0x102]]  ;;  %s305_s12 = smov [#allocation5]  }
  0x17   :  { %v209_v10 = vrot.slane %v195_v8, %v346_v6  ;;  %212 = vst.msk [vmem:[#allocation5 + $0x3] sm:$0x1] %vm77_vm0, %v202_v9  ;;  %s219_s13 = sshll.u32 %s305_s12, 4  ;;  %s220_s13 = int_to_ptr.vmem [resolvable:$true] %s219_s13 }
  0x18   :  { %v34_v15 = vstv %s24_s3  ;;  %v37_v16 = vstv %s231_s4  ;;  %s265_s14 = scalar_lea.vmem %s220_s13, 128  ;;  %p270_p4 = scmp.lt.s32.totalorder %s220_s13, %s220_s13 }
  0x19   :  { %44 = vrot.lane.b32.xlu1 %v337_v0, %s299_s25  ;;  %41 = vrot.lane.b32.xlu0 %v337_v0, %s300_s26  ;;  %213 = vst.msk [vmem:[#allocation5 + $0x7] sm:$0x1] %vm77_vm0, %v209_v10  ;;  %v92_v20 = vstv %s234_s5  ;;  %v38_v22 = vmul.f32 %v37_v16, %v337_v0  ;;  %v89_v23 = vstv %s233_s6  ;;  %p266_p3 = scmp.ne.s32.totalorder %s220_s13, %s265_s14  ;;  %p271_p5 = scmp.lt.s32.totalorder %s265_s14, %s265_s14 }
  0x1a   :  { %v49_v25 = vstv %s360_s7  ;;  %v93_v28 = vmul.f32 %v92_v20, %v337_v0  ;;  %v146_v32 = vstv %s362_s8 }
  0x1b   :  { %v143_v34 = vstv %s364_s9  ;;  %v104_v36 = vstv %s366_s10  ;;  %v147_v40 = vmul.f32 %v146_v32, %v337_v0  ;;  %p272_p6 = por %p271_p5, %p270_p4 }
  0x1c   :  { %v158_v46 = vstv %s370_s11 }
  0x1d   :  { %99 = vrot.lane.b32.xlu1 %v337_v0, %s301_s27  ;;  %96 = vrot.lane.b32.xlu0 %v337_v0, %s302_s28  ;;  %p273_p7 = pnand %p272_p6, %p266_p3 }
  0x21   :  { %153 = vrot.lane.b32.xlu1 %v337_v0, %s303_s29  ;;  %150 = vrot.lane.b32.xlu0 %v337_v0, %s304_s30 }
  0x7f   :  { %v82_v11 = vpop.permute.xlu1 %81  ;;  %v27_v12 = vpop.permute.xlu0 %26 }
  0x83   :  { %v85_v13 = vpop.permute.xlu1 %84  ;;  %v30_v14 = vpop.permute.xlu0 %29 }
  0x84   :  { %v33_v17 = vsel %vm32_vm1, %v27_v12, %v30_v14  ;;  %v88_v24 = vsel %vm87_vm2, %v82_v11, %v85_v13 }
  0x85   :  { %v35_v21 = vmul.f32 %v34_v15, %v33_v17  ;;  %v90_v30 = vmul.f32 %v89_v23, %v88_v24 }
  0x87   :  { %v139_v18 = vpop.permute.xlu1 %138  ;;  %v136_v19 = vpop.permute.xlu0 %135  ;;  %v39_v31 = vadd.f32 %v38_v22, %v35_v21  ;;  %v94_v42 = vadd.f32 %v93_v28, %v90_v30 }
  0x88   :  { %v142_v35 = vsel %vm141_vm4, %v136_v19, %v139_v18 }
  0x89   :  { %v144_v43 = vmul.f32 %v143_v34, %v142_v35 }
  0x8b   :  { %v45_v26 = vpop.permute.xlu1 %44  ;;  %v42_v27 = vpop.permute.xlu0 %41  ;;  %v148_v53 = vadd.f32 %v147_v40, %v144_v43 }
  0x8c   :  { %v48_v29 = vsel %vm47_vm3, %v42_v27, %v45_v26 }
  0x8d   :  { %v50_v33 = vmul.f32 %v49_v25, %v48_v29 }
  0x8f   :  { %v51_v37 = vadd.f32 %v50_v33, %v39_v31  ;;  %v100_v38 = vpop.permute.xlu1 %99  ;;  %v97_v39 = vpop.permute.xlu0 %96 }
  0x90   :  { %v103_v41 = vsel %vm102_vm5, %v97_v39, %v100_v38 }
  0x91   :  { %v59_v44 = vrot.slane %v51_v37, %v346_v6  ;;  %v105_v45 = vmul.f32 %v104_v36, %v103_v41 }
  0x93   :  { %v60_v47 = vcombine.high %v59_v44, %v59_v44  ;;  %v67_v48 = vrot.slane %v59_v44, %v346_v6  ;;  %v106_v49 = vadd.f32 %v105_v45, %v94_v42  ;;  %v154_v50 = vpop.permute.xlu1 %153  ;;  %v151_v51 = vpop.permute.xlu0 %150 }
  0x94   :  { %v157_v52 = vsel %vm156_vm6, %v151_v51, %v154_v50 }
  0x95   :  { %v74_v54 = vrot.slane %v60_v47, %v346_v6  ;;  %78 = vst.msk [vmem:[#allocation5] sm:$0x1] %vm77_vm0, %v67_v48  ;;  %v114_v55 = vrot.slane %v106_v49, %v346_v6  ;;  %v159_v56 = vmul.f32 %v158_v46, %v157_v52 }
  0x97   :  { %79 = vst.msk [vmem:[#allocation5 + $0x4] sm:$0x1] %vm77_vm0, %v74_v54  ;;  %v115_v57 = vcombine.high %v114_v55, %v114_v55  ;;  %v122_v58 = vrot.slane %v114_v55, %v346_v6  ;;  %v160_v59 = vadd.f32 %v159_v56, %v148_v53 }
  0x99   :  { %v129_v60 = vrot.slane %v115_v57, %v346_v6  ;;  %132 = vst.msk [vmem:[#allocation5 + $0x1] sm:$0x1] %vm77_vm0, %v122_v58  ;;  %v168_v61 = vrot.slane %v160_v59, %v346_v6 }
  0x9b   :  { %133 = vst.msk [vmem:[#allocation5 + $0x5] sm:$0x1] %vm77_vm0, %v129_v60  ;;  %v169_v62 = vcombine.high %v168_v61, %v168_v61  ;;  %v176_v63 = vrot.slane %v168_v61, %v346_v6 }
  0x9d   :  { %v183_v0 = vrot.slane %v169_v62, %v346_v6  ;;  %186 = vst.msk [vmem:[#allocation5 + $0x2] sm:$0x1] %vm77_vm0, %v176_v63 }
  0x9f   :  { %187 = vst.msk [vmem:[#allocation5 + $0x6] sm:$0x1] %vm77_vm0, %v183_v0 }
  0xa0   :  { %276 = shalt.err (!%p273_p7)
}
  0xa1   :  { %s277_s17 = scalar_lea.hbm %s408_s2, 128 }
  0xa2   :  { %p278_p8 = scmp.ne.s32.totalorder %s408_s2, %s277_s17  ;;  %p281_p9 = scmp.lt.u32.totalorder %s277_s17, %s408_s2 }
  0xa4   :  { %p283_p10 = pnand %p281_p9, %p278_p8 }
  0xa6   :  { %286 = shalt.err (!%p283_p10)
}
  0xa7   :  { %s306_s22 = smov 64  }
  0xa8   :  { %225 = dma.vmem_to_hbm [thread:$0]  %s220_s13, 128, %s408_s2, [#allocation3], %s306_s22, %s306_s22, %s297_s24  }
  0xa9   :  { %289 = dma.done.wait [#allocation3], 128  }
  0xaa   :  { %290 = vsyncadd [#allocation3], 4294967168 }
  0xab   :  { %229 = vsyncpa [#allocation3], 1 }
  0xac   :  { %230 = vsyncpa [#allocation4], 1 }

</bundles_post_ra>
